<compile_context>
chip_gen: v7x
topology: tpu7x:2x2x1
jax: 0.10.0
libtpu: 0.0.40
codegen_flags: <defaults>
</compile_context>

<pallas_src>
import jax
import jax.numpy as jnp
from jax.experimental import pallas as pl
from jax.experimental.pallas import tpu as pltpu


# ---------------------------------------------------------------------------
# Kernel factory. Each grid step processes Bk branches; block shapes:
#   cj_ref   : SMEM (B, 2) f32          -> [scale, bias] per branch (folded ColorJiggle)
#   img_ref  : VMEM (Bk, M, HW) f32     -> all N*C image rows of the branches in this step
#   mask_ref : VMEM (Bk, M, HW) f32     -> all N*C mask  rows
#   sbl_ref  : VMEM (Bk, HW, HW) bf16   -> transposed bilinear sampling matrix
#   gather path: idx_ref (Bk,1,HW) i32 source index, val_ref (Bk,1,HW) f32 validity
#   matmul fallback: snn_ref (Bk,HW,HW) bf16 transposed nearest one-hot matrix
# ---------------------------------------------------------------------------
def _make_branch_kernel(Bk, M, HW, mask_mode):
    if mask_mode == "gather":
        def kernel(cj_ref, img_ref, mask_ref, sbl_ref, idx_ref, val_ref,
                   oimg_ref, omask_ref):
            b0 = pl.program_id(0) * Bk
            for i in range(Bk):                       # static, Bk <= B (tiny)
                scale = cj_ref[b0 + i, 0]
                bias = cj_ref[b0 + i, 1]
                # ColorJiggle folded into one FMA, clipped to [0,1]; bf16 operands for MXU.
                jig = jnp.clip(img_ref[i] * scale + bias, 0.0, 1.0).astype(jnp.bfloat16)
                # RandomAffine (bilinear) as a dense sampling matmul, f32 accumulation.
                oimg_ref[i] = jnp.dot(
                    jig, sbl_ref[i],
                    preferred_element_type=jnp.float32).astype(oimg_ref.dtype)
                # Mask: nearest-neighbour warp as a lane gather (XLU path) — no MXU, exact f32.
                idx = jnp.broadcast_to(idx_ref[i], (M, HW))
                omask_ref[i] = (jnp.take_along_axis(mask_ref[i], idx, axis=-1)
                                * val_ref[i]).astype(omask_ref.dtype)
        return kernel

    def kernel(cj_ref, img_ref, mask_ref, sbl_ref, snn_ref, oimg_ref, omask_ref):
        b0 = pl.program_id(0) * Bk
        for i in range(Bk):
            scale = cj_ref[b0 + i, 0]
            bias = cj_ref[b0 + i, 1]
            jig = jnp.clip(img_ref[i] * scale + bias, 0.0, 1.0).astype(jnp.bfloat16)
            oimg_ref[i] = jnp.dot(
                jig, sbl_ref[i],
                preferred_element_type=jnp.float32).astype(oimg_ref.dtype)
            # Fallback: nearest warp via one-hot matmul (bf16 exact for 0/1 / small-int masks).
            omask_ref[i] = jnp.dot(
                mask_ref[i].astype(jnp.bfloat16), snn_ref[i],
                preferred_element_type=jnp.float32).astype(omask_ref.dtype)
    return kernel


# ---------------------------------------------------------------------------
# Grid policy:
#   - v7x (2 TensorCores/chip): grid=(B,) + CORE_PARALLEL -> one branch per core.
#     (plain "parallel" is a measured no-op for codegen; CORE_PARALLEL actually shards.)
#   - v5e/v6e (1 TC): collapse the grid to a single step; working set <1 MiB, nothing to
#     pipeline, and per-step overhead (~0.35us) would dominate a ~1-2us kernel.
# ---------------------------------------------------------------------------
def _pick_grid(B):
    kind = ""
    try:
        kind = jax.devices()[0].device_kind.lower()
    except Exception:
        pass
    if B > 1 and "v7" in kind:
        return B, (pltpu.CORE_PARALLEL,)
    return 1, ("arbitrary",)


# ---------------------------------------------------------------------------
# Per-branch warp tables for a fixed affine (inverse mapping, zero padding outside):
#   - transposed bilinear sampling matrix (bf16, right-multiply form) for the image path,
#   - nearest-neighbour source index (int32) + validity (f32) vectors for the mask gather,
#   - transposed nearest one-hot matrix (bf16) kept only for the matmul fallback.
# ---------------------------------------------------------------------------
def make_warp_tables(H, W, angle_deg, tx, ty):
    theta = jnp.deg2rad(jnp.float32(angle_deg))
    cy, cx = (H - 1) / 2.0, (W - 1) / 2.0
    cos, sin = jnp.cos(theta), jnp.sin(theta)

    ys, xs = jnp.meshgrid(jnp.arange(H, dtype=jnp.float32),
                          jnp.arange(W, dtype=jnp.float32), indexing="ij")
    xo = xs - cx - tx
    yo = ys - cy - ty
    xsrc = cos * xo + sin * yo + cx
    ysrc = -sin * xo + cos * yo + cy

    HW = H * W
    out_idx = jnp.arange(HW)

    # Bilinear sampling matrix.
    x0 = jnp.floor(xsrc)
    y0 = jnp.floor(ysrc)
    wx = xsrc - x0
    wy = ysrc - y0
    S = jnp.zeros((HW, HW), jnp.float32)
    for dy, dx, w in ((0, 0, (1 - wy) * (1 - wx)), (0, 1, (1 - wy) * wx),
                      (1, 0, wy * (1 - wx)), (1, 1, wy * wx)):
        yy = y0 + dy
        xx = x0 + dx
        valid = (yy >= 0) & (yy < H) & (xx >= 0) & (xx < W)
        src = (jnp.clip(yy, 0, H - 1) * W + jnp.clip(xx, 0, W - 1)).astype(jnp.int32).reshape(-1)
        S = S.at[out_idx, src].add((w * valid).reshape(-1))

    # Nearest-neighbour: index + validity (gather form) and one-hot matrix (fallback form).
    yn = jnp.round(ysrc)
    xn = jnp.round(xsrc)
    validn = ((yn >= 0) & (yn < H) & (xn >= 0) & (xn < W)).reshape(-1)
    srcn = (jnp.clip(yn, 0, H - 1) * W + jnp.clip(xn, 0, W - 1)).astype(jnp.int32).reshape(-1)
    Snn = jnp.zeros((HW, HW), jnp.float32).at[out_idx, srcn].set(validn.astype(jnp.float32))

    return (S.T.astype(jnp.bfloat16), srcn.astype(jnp.int32),
            validn.astype(jnp.float32), Snn.T.astype(jnp.bfloat16))


# ---------------------------------------------------------------------------
# Wrapper: ManyToManyAugmentationDispather.forward
# ---------------------------------------------------------------------------
def many_to_many_dispatch(inputs, branch_tables, cj_scale_bias,
                          mask_mode="gather", grid_b=None, semantics=None):
    """inputs: list of (image, mask) pairs, each (N,C,H,W) float32 — one pair per branch.
    branch_tables: list of make_warp_tables(...) tuples, one per branch.
    cj_scale_bias: (B, 2) float32 [scale, bias] per branch (folded ColorJiggle).
    Returns: list of (aug_image, aug_mask) pairs, one per branch (PyTorch semantics)."""
    B = len(inputs)
    N, C, H, W = inputs[0][0].shape
    HW = H * W
    M = N * C                                        # all rows of a branch feed one MXU dot

    # No pad-to-8: block second-minor dim == full array dim (M) is legal, so nothing is wasted.
    imgs = jnp.stack([img.reshape(M, HW) for img, _ in inputs])       # (B, M, HW) f32
    masks = jnp.stack([m.reshape(M, HW) for _, m in inputs])          # (B, M, HW) f32
    sbl_T = jnp.stack([t[0] for t in branch_tables])                  # (B, HW, HW) bf16
    nn_idx = jnp.stack([t[1] for t in branch_tables]).reshape(B, 1, HW)   # (B,1,HW) i32
    nn_val = jnp.stack([t[2] for t in branch_tables]).reshape(B, 1, HW)   # (B,1,HW) f32
    snn_T = jnp.stack([t[3] for t in branch_tables])                  # (B, HW, HW) bf16 (fallback)

    if grid_b is None or semantics is None:
        grid_b, semantics = _pick_grid(B)
    Bk = B // grid_b

    def vspec(shape):
        return pl.BlockSpec(shape, lambda b: (b, 0, 0))

    common_in = [
        pl.BlockSpec(memory_space=pltpu.MemorySpace.SMEM),   # (B, 2) color scale/bias
        vspec((Bk, M, HW)),                                  # image rows
        vspec((Bk, M, HW)),                                  # mask rows
        vspec((Bk, HW, HW)),                                 # bilinear warp^T (bf16)
    ]

    if mask_mode == "gather":
        operands = (cj_scale_bias, imgs, masks, sbl_T, nn_idx, nn_val)
        in_specs = common_in + [vspec((Bk, 1, HW)), vspec((Bk, 1, HW))]
        flops = 2 * B * M * HW * HW                          # one (M,HW)@(HW,HW) dot per branch
        bytes_accessed = (4 * imgs.size + 4 * masks.size + 2 * 4 * B * M * HW
                          + 2 * B * HW * HW + 8 * B * HW)
    else:
        operands = (cj_scale_bias, imgs, masks, sbl_T, snn_T)
        in_specs = common_in + [vspec((Bk, HW, HW))]
        flops = 4 * B * M * HW * HW
        bytes_accessed = (4 * imgs.size + 4 * masks.size + 2 * 4 * B * M * HW
                          + 2 * 2 * B * HW * HW)

    out_img, out_mask = pl.pallas_call(
        _make_branch_kernel(Bk, M, HW, mask_mode),
        grid=(grid_b,),
        in_specs=in_specs,
        out_specs=[vspec((Bk, M, HW)), vspec((Bk, M, HW))],
        out_shape=[
            jax.ShapeDtypeStruct((B, M, HW), jnp.float32),
            jax.ShapeDtypeStruct((B, M, HW), jnp.float32),
        ],
        compiler_params=pltpu.CompilerParams(dimension_semantics=tuple(semantics)),
        cost_estimate=pl.CostEstimate(flops=flops, transcendentals=0,
                                      bytes_accessed=int(bytes_accessed)),
    )(*operands)

    return [(out_img[b].reshape(N, C, H, W), out_mask[b].reshape(N, C, H, W))
            for b in range(B)]


# ---------------------------------------------------------------------------
# Pure-JAX reference (same math: bf16 image matmul emulation, exact f32 mask gather).
# ---------------------------------------------------------------------------
def reference(inputs, branch_tables, cj_scale_bias):
    outs = []
    for b, (img, mask) in enumerate(inputs):
        N, C, H, W = img.shape
        HW = H * W
        sbl_T, nn_idx, nn_val, _ = branch_tables[b]
        scale, bias = cj_scale_bias[b, 0], cj_scale_bias[b, 1]
        jig = jnp.clip(img.reshape(-1, HW) * scale + bias, 0.0, 1.0)
        jig = jig.astype(jnp.bfloat16).astype(jnp.float32)
        oimg = (jig @ sbl_T.astype(jnp.float32)).reshape(N, C, H, W)
        m = mask.reshape(-1, HW)
        omask = (m[:, nn_idx] * nn_val[None, :]).reshape(N, C, H, W)
        outs.append((oimg, omask))
    return outs


if __name__ == "__main__":
    key = jax.random.PRNGKey(0)
    N, C, H, W = 2, 3, 16, 16          # small shapes; HW = 256 is lane-aligned
    B = 2                              # two branches in the dispatcher

    k1, k2 = jax.random.split(key)
    input_1 = jax.random.uniform(k1, (N, C, H, W), dtype=jnp.float32)
    input_2 = jax.random.uniform(k2, (N, C, H, W), dtype=jnp.float32)
    mask_1 = jnp.ones((N, C, H, W), jnp.float32)
    mask_2 = jnp.ones((N, C, H, W), jnp.float32)
    inputs = [(input_1, mask_1), (input_2, mask_2)]

    # Deterministic "sampled" augmentation parameters per branch.
    affine_params = [(30.0, 1.5, -0.75), (-45.0, -1.0, 2.0)]             # (angle_deg, tx, ty)
    color_params = [(1.05, 0.95), (0.92, 1.08)]                          # (brightness, contrast)
    # Fold jiggle: y = (x*b - 0.5)*c + 0.5 = x*(b*c) + (0.5 - 0.5*c)
    cj_scale_bias = jnp.array([[br * ct, 0.5 - 0.5 * ct] for br, ct in color_params],
                              dtype=jnp.float32)                          # (B, 2)

    branch_tables = [make_warp_tables(H, W, a, tx, ty) for a, tx, ty in affine_params]
    refs = reference(inputs, branch_tables, cj_scale_bias)

    # Config cascade: primary = in-kernel gather + generation-appropriate grid; fall back to the
    # one-hot matmul kernel (and to a fully collapsed grid) if a config fails to lower/verify.
    grid_b, sem = _pick_grid(B)
    configs = [("gather", grid_b, sem), ("matmul", grid_b, sem)]
    if grid_b != 1:
        configs += [("gather", 1, ("arbitrary",)), ("matmul", 1, ("arbitrary",))]

    outputs, last_err = None, None
    for mask_mode, gb, dsem in configs:
        try:
            outs = many_to_many_dispatch(inputs, branch_tables, cj_scale_bias,
                                         mask_mode=mask_mode, grid_b=gb, semantics=dsem)
            for oi, om in outs:
                jax.block_until_ready(oi)
                jax.block_until_ready(om)
            ok = all(bool(jnp.allclose(oi, ri, atol=2e-2)) and bool(jnp.allclose(om, rm, atol=2e-2))
                     for (oi, om), (ri, rm) in zip(outs, refs))
            if ok:
                outputs = outs
                break
            last_err = AssertionError(f"output mismatch for config {(mask_mode, gb, dsem)}")
        except Exception as e:          # lowering/compile failure -> try the next config
            last_err = e

    if outputs is None:
        raise last_err
    print("KERNEL_OK")
</pallas_src>

<mosaic_0001>
module attributes {stable_mosaic.version = 11 : i64} {
  func.func @kernel(%arg0: i32, %arg1: memref<2x2xf32, #tpu.memory_space<smem>>, %arg2: memref<2x6x256xf32, #tpu.memory_space<vmem>>, %arg3: memref<2x6x256xf32, #tpu.memory_space<vmem>>, %arg4: memref<2x256x256xbf16, #tpu.memory_space<vmem>>, %arg5: memref<2x1x256xi32, #tpu.memory_space<vmem>>, %arg6: memref<2x1x256xf32, #tpu.memory_space<vmem>>, %arg7: memref<2x6x256xf32, #tpu.memory_space<vmem>>, %arg8: memref<2x6x256xf32, #tpu.memory_space<vmem>>) attributes {dimension_semantics = [#tpu.dimension_semantics<arbitrary>], iteration_bounds = array<i64: 1>, scalar_prefetch = 0 : i64, scratch_operands = 0 : i64, tpu.core_type = #tpu.core_type<tc>, window_params = [{transform_indices = @transform_0, window_bounds = array<i64: 2, 2>}, {transform_indices = @transform_1, window_bounds = array<i64: 2, 6, 256>}, {transform_indices = @transform_2, window_bounds = array<i64: 2, 6, 256>}, {transform_indices = @transform_3, window_bounds = array<i64: 2, 256, 256>}, {transform_indices = @transform_4, window_bounds = array<i64: 2, 1, 256>}, {transform_indices = @transform_5, window_bounds = array<i64: 2, 1, 256>}, {transform_indices = @transform_6, window_bounds = array<i64: 2, 6, 256>}, {transform_indices = @transform_7, window_bounds = array<i64: 2, 6, 256>}]} {
    %c2_i32 = arith.constant 2 : i32
    %0 = arith.muli %arg0, %c2_i32 : i32
    %c0_i32 = arith.constant 0 : i32
    %1 = arith.addi %0, %c0_i32 : i32
    %2 = arith.index_cast %1 : i32 to index
    %c0 = arith.constant 0 : index
    %3 = memref.load %arg1[%2, %c0] : memref<2x2xf32, #tpu.memory_space<smem>>
    %c0_i32_0 = arith.constant 0 : i32
    %4 = arith.addi %0, %c0_i32_0 : i32
    %5 = arith.index_cast %4 : i32 to index
    %c1 = arith.constant 1 : index
    %6 = memref.load %arg1[%5, %c1] : memref<2x2xf32, #tpu.memory_space<smem>>
    %c0_1 = arith.constant 0 : index
    %c0_2 = arith.constant 0 : index
    %c0_3 = arith.constant 0 : index
    %7 = vector.load %arg2[%c0_1, %c0_2, %c0_3] : memref<2x6x256xf32, #tpu.memory_space<vmem>>, vector<1x6x256xf32>
    %8 = vector.shape_cast %7 : vector<1x6x256xf32> to vector<6x256xf32>
    %9 = vector.broadcast %3 : f32 to vector<6x256xf32>
    %10 = arith.mulf %8, %9 : vector<6x256xf32>
    %11 = vector.broadcast %6 : f32 to vector<6x256xf32>
    %12 = arith.addf %10, %11 : vector<6x256xf32>
    %cst = arith.constant 0.000000e+00 : f32
    %cst_4 = arith.constant 1.000000e+00 : f32
    %13 = vector.broadcast %cst : f32 to vector<6x256xf32>
    %14 = arith.maximumf %13, %12 : vector<6x256xf32>
    %15 = vector.broadcast %cst_4 : f32 to vector<6x256xf32>
    %16 = arith.minimumf %15, %14 : vector<6x256xf32>
    %17 = arith.truncf %16 : vector<6x256xf32> to vector<6x256xbf16>
    %c0_5 = arith.constant 0 : index
    %c0_6 = arith.constant 0 : index
    %c0_7 = arith.constant 0 : index
    %18 = vector.load %arg4[%c0_5, %c0_6, %c0_7] : memref<2x256x256xbf16, #tpu.memory_space<vmem>>, vector<1x256x256xbf16>
    %19 = vector.shape_cast %18 : vector<1x256x256xbf16> to vector<256x256xbf16>
    %cst_8 = arith.constant dense<0.000000e+00> : vector<6x256xf32>
    %20 = tpu.matmul %17, %19, %cst_8 {dimension_numbers = #tpu.dot_dimension_numbers<[1], [0], [0], [1], [0, 0, 1, 1], [], []>} : vector<6x256xbf16>, vector<256x256xbf16>, vector<6x256xf32> -> vector<6x256xf32>
    %c0_9 = arith.constant 0 : index
    %c0_10 = arith.constant 0 : index
    %c0_11 = arith.constant 0 : index
    %21 = vector.load %arg7[%c0_9, %c0_10, %c0_11] : memref<2x6x256xf32, #tpu.memory_space<vmem>>, vector<1x6x256xf32>
    %22 = vector.shape_cast %21 : vector<1x6x256xf32> to vector<6x256xf32>
    %23 = vector.shape_cast %20 : vector<6x256xf32> to vector<1x6x256xf32>
    tpu.vector_store %arg7[%c0_9, %c0_10, %c0_11], %23 {strides = array<i32>} : memref<2x6x256xf32, #tpu.memory_space<vmem>>, vector<1x6x256xf32>,
    %c0_12 = arith.constant 0 : index
    %c0_13 = arith.constant 0 : index
    %c0_14 = arith.constant 0 : index
    %24 = vector.load %arg5[%c0_12, %c0_13, %c0_14] : memref<2x1x256xi32, #tpu.memory_space<vmem>>, vector<1x1x256xi32>
    %25 = vector.shape_cast %24 : vector<1x1x256xi32> to vector<1x256xi32>
    %26 = vector.shape_cast %25 : vector<1x256xi32> to vector<1x256xi32>
    %27 = vector.broadcast %26 : vector<1x256xi32> to vector<6x256xi32>
    %c0_15 = arith.constant 0 : index
    %c0_16 = arith.constant 0 : index
    %c0_17 = arith.constant 0 : index
    %28 = vector.load %arg3[%c0_15, %c0_16, %c0_17] : memref<2x6x256xf32, #tpu.memory_space<vmem>>, vector<1x6x256xf32>
    %29 = vector.shape_cast %28 : vector<1x6x256xf32> to vector<6x256xf32>
    %c0_i32_18 = arith.constant 0 : i32
    %30 = vector.broadcast %c0_i32_18 : i32 to vector<6x256xi32>
    %31 = arith.cmpi slt, %27, %30 : vector<6x256xi32>
    %c256_i32 = arith.constant 256 : i32
    %32 = vector.broadcast %c256_i32 : i32 to vector<6x256xi32>
    %33 = arith.addi %27, %32 : vector<6x256xi32>
    %34 = arith.select %31, %33, %27 : vector<6x256xi1>, vector<6x256xi32>
    %35 = vector.shape_cast %34 : vector<6x256xi32> to vector<6x256x1xi32>
    %36 = vector.shape_cast %35 : vector<6x256x1xi32> to vector<6x256xi32>
    %37 = tpu.dynamic_gather %29[%36] in [1] : vector<6x256xf32>, vector<6x256xi32> -> vector<6x256xf32>
    %c0_19 = arith.constant 0 : index
    %c0_20 = arith.constant 0 : index
    %c0_21 = arith.constant 0 : index
    %38 = vector.load %arg6[%c0_19, %c0_20, %c0_21] : memref<2x1x256xf32, #tpu.memory_space<vmem>>, vector<1x1x256xf32>
    %39 = vector.shape_cast %38 : vector<1x1x256xf32> to vector<1x256xf32>
    %40 = vector.broadcast %39 : vector<1x256xf32> to vector<6x256xf32>
    %41 = arith.mulf %37, %40 : vector<6x256xf32>
    %c0_22 = arith.constant 0 : index
    %c0_23 = arith.constant 0 : index
    %c0_24 = arith.constant 0 : index
    %42 = vector.load %arg8[%c0_22, %c0_23, %c0_24] : memref<2x6x256xf32, #tpu.memory_space<vmem>>, vector<1x6x256xf32>
    %43 = vector.shape_cast %42 : vector<1x6x256xf32> to vector<6x256xf32>
    %44 = vector.shape_cast %41 : vector<6x256xf32> to vector<1x6x256xf32>
    tpu.vector_store %arg8[%c0_22, %c0_23, %c0_24], %44 {strides = array<i32>} : memref<2x6x256xf32, #tpu.memory_space<vmem>>, vector<1x6x256xf32>,
    %c1_i32 = arith.constant 1 : i32
    %45 = arith.addi %0, %c1_i32 : i32
    %46 = arith.index_cast %45 : i32 to index
    %c0_25 = arith.constant 0 : index
    %47 = memref.load %arg1[%46, %c0_25] : memref<2x2xf32, #tpu.memory_space<smem>>
    %c1_i32_26 = arith.constant 1 : i32
    %48 = arith.addi %0, %c1_i32_26 : i32
    %49 = arith.index_cast %48 : i32 to index
    %c1_27 = arith.constant 1 : index
    %50 = memref.load %arg1[%49, %c1_27] : memref<2x2xf32, #tpu.memory_space<smem>>
    %c1_28 = arith.constant 1 : index
    %c0_29 = arith.constant 0 : index
    %c0_30 = arith.constant 0 : index
    %51 = vector.load %arg2[%c1_28, %c0_29, %c0_30] : memref<2x6x256xf32, #tpu.memory_space<vmem>>, vector<1x6x256xf32>
    %52 = vector.shape_cast %51 : vector<1x6x256xf32> to vector<6x256xf32>
    %53 = vector.broadcast %47 : f32 to vector<6x256xf32>
    %54 = arith.mulf %52, %53 : vector<6x256xf32>
    %55 = vector.broadcast %50 : f32 to vector<6x256xf32>
    %56 = arith.addf %54, %55 : vector<6x256xf32>
    %cst_31 = arith.constant 0.000000e+00 : f32
    %cst_32 = arith.constant 1.000000e+00 : f32
    %57 = vector.broadcast %cst_31 : f32 to vector<6x256xf32>
    %58 = arith.maximumf %57, %56 : vector<6x256xf32>
    %59 = vector.broadcast %cst_32 : f32 to vector<6x256xf32>
    %60 = arith.minimumf %59, %58 : vector<6x256xf32>
    %61 = arith.truncf %60 : vector<6x256xf32> to vector<6x256xbf16>
    %c1_33 = arith.constant 1 : index
    %c0_34 = arith.constant 0 : index
    %c0_35 = arith.constant 0 : index
    %62 = vector.load %arg4[%c1_33, %c0_34, %c0_35] : memref<2x256x256xbf16, #tpu.memory_space<vmem>>, vector<1x256x256xbf16>
    %63 = vector.shape_cast %62 : vector<1x256x256xbf16> to vector<256x256xbf16>
    %cst_36 = arith.constant dense<0.000000e+00> : vector<6x256xf32>
    %64 = tpu.matmul %61, %63, %cst_36 {dimension_numbers = #tpu.dot_dimension_numbers<[1], [0], [0], [1], [0, 0, 1, 1], [], []>} : vector<6x256xbf16>, vector<256x256xbf16>, vector<6x256xf32> -> vector<6x256xf32>
    %c1_37 = arith.constant 1 : index
    %c0_38 = arith.constant 0 : index
    %c0_39 = arith.constant 0 : index
    %65 = vector.load %arg7[%c1_37, %c0_38, %c0_39] : memref<2x6x256xf32, #tpu.memory_space<vmem>>, vector<1x6x256xf32>
    %66 = vector.shape_cast %65 : vector<1x6x256xf32> to vector<6x256xf32>
    %67 = vector.shape_cast %64 : vector<6x256xf32> to vector<1x6x256xf32>
    tpu.vector_store %arg7[%c1_37, %c0_38, %c0_39], %67 {strides = array<i32>} : memref<2x6x256xf32, #tpu.memory_space<vmem>>, vector<1x6x256xf32>,
    %c1_40 = arith.constant 1 : index
    %c0_41 = arith.constant 0 : index
    %c0_42 = arith.constant 0 : index
    %68 = vector.load %arg5[%c1_40, %c0_41, %c0_42] : memref<2x1x256xi32, #tpu.memory_space<vmem>>, vector<1x1x256xi32>
    %69 = vector.shape_cast %68 : vector<1x1x256xi32> to vector<1x256xi32>
    %70 = vector.shape_cast %69 : vector<1x256xi32> to vector<1x256xi32>
    %71 = vector.broadcast %70 : vector<1x256xi32> to vector<6x256xi32>
    %c1_43 = arith.constant 1 : index
    %c0_44 = arith.constant 0 : index
    %c0_45 = arith.constant 0 : index
    %72 = vector.load %arg3[%c1_43, %c0_44, %c0_45] : memref<2x6x256xf32, #tpu.memory_space<vmem>>, vector<1x6x256xf32>
    %73 = vector.shape_cast %72 : vector<1x6x256xf32> to vector<6x256xf32>
    %c0_i32_46 = arith.constant 0 : i32
    %74 = vector.broadcast %c0_i32_46 : i32 to vector<6x256xi32>
    %75 = arith.cmpi slt, %71, %74 : vector<6x256xi32>
    %c256_i32_47 = arith.constant 256 : i32
    %76 = vector.broadcast %c256_i32_47 : i32 to vector<6x256xi32>
    %77 = arith.addi %71, %76 : vector<6x256xi32>
    %78 = arith.select %75, %77, %71 : vector<6x256xi1>, vector<6x256xi32>
    %79 = vector.shape_cast %78 : vector<6x256xi32> to vector<6x256x1xi32>
    %80 = vector.shape_cast %79 : vector<6x256x1xi32> to vector<6x256xi32>
    %81 = tpu.dynamic_gather %73[%80] in [1] : vector<6x256xf32>, vector<6x256xi32> -> vector<6x256xf32>
    %c1_48 = arith.constant 1 : index
    %c0_49 = arith.constant 0 : index
    %c0_50 = arith.constant 0 : index
    %82 = vector.load %arg6[%c1_48, %c0_49, %c0_50] : memref<2x1x256xf32, #tpu.memory_space<vmem>>, vector<1x1x256xf32>
    %83 = vector.shape_cast %82 : vector<1x1x256xf32> to vector<1x256xf32>
    %84 = vector.broadcast %83 : vector<1x256xf32> to vector<6x256xf32>
    %85 = arith.mulf %81, %84 : vector<6x256xf32>
    %c1_51 = arith.constant 1 : index
    %c0_52 = arith.constant 0 : index
    %c0_53 = arith.constant 0 : index
    %86 = vector.load %arg8[%c1_51, %c0_52, %c0_53] : memref<2x6x256xf32, #tpu.memory_space<vmem>>, vector<1x6x256xf32>
    %87 = vector.shape_cast %86 : vector<1x6x256xf32> to vector<6x256xf32>
    %88 = vector.shape_cast %85 : vector<6x256xf32> to vector<1x6x256xf32>
    tpu.vector_store %arg8[%c1_51, %c0_52, %c0_53], %88 {strides = array<i32>} : memref<2x6x256xf32, #tpu.memory_space<vmem>>, vector<1x6x256xf32>,
    return
  }
  func.func @transform_0(%arg0: i32) -> (i32, i32) {
    %c0_i32 = arith.constant 0 : i32
    %c0_i32_0 = arith.constant 0 : i32
    %c0_i32_1 = arith.constant 0 : i32
    return %c0_i32, %c0_i32_0 : i32, i32
  }
  func.func @transform_1(%arg0: i32) -> (i32, i32, i32) {
    %c0_i32 = arith.constant 0 : i32
    %c0_i32_0 = arith.constant 0 : i32
    %c0_i32_1 = arith.constant 0 : i32
    return %arg0, %c0_i32, %c0_i32_0 : i32, i32, i32
  }
  func.func @transform_2(%arg0: i32) -> (i32, i32, i32) {
    %c0_i32 = arith.constant 0 : i32
    %c0_i32_0 = arith.constant 0 : i32
    %c0_i32_1 = arith.constant 0 : i32
    return %arg0, %c0_i32, %c0_i32_0 : i32, i32, i32
  }
  func.func @transform_3(%arg0: i32) -> (i32, i32, i32) {
    %c0_i32 = arith.constant 0 : i32
    %c0_i32_0 = arith.constant 0 : i32
    %c0_i32_1 = arith.constant 0 : i32
    return %arg0, %c0_i32, %c0_i32_0 : i32, i32, i32
  }
  func.func @transform_4(%arg0: i32) -> (i32, i32, i32) {
    %c0_i32 = arith.constant 0 : i32
    %c0_i32_0 = arith.constant 0 : i32
    %c0_i32_1 = arith.constant 0 : i32
    return %arg0, %c0_i32, %c0_i32_0 : i32, i32, i32
  }
  func.func @transform_5(%arg0: i32) -> (i32, i32, i32) {
    %c0_i32 = arith.constant 0 : i32
    %c0_i32_0 = arith.constant 0 : i32
    %c0_i32_1 = arith.constant 0 : i32
    return %arg0, %c0_i32, %c0_i32_0 : i32, i32, i32
  }
  func.func @transform_6(%arg0: i32) -> (i32, i32, i32) {
    %c0_i32 = arith.constant 0 : i32
    %c0_i32_0 = arith.constant 0 : i32
    %c0_i32_1 = arith.constant 0 : i32
    return %arg0, %c0_i32, %c0_i32_0 : i32, i32, i32
  }
  func.func @transform_7(%arg0: i32) -> (i32, i32, i32) {
    %c0_i32 = arith.constant 0 : i32
    %c0_i32_0 = arith.constant 0 : i32
    %c0_i32_1 = arith.constant 0 : i32
    return %arg0, %c0_i32, %c0_i32_0 : i32, i32, i32
  }
}

module attributes {stable_mosaic.version = 11 : i64} {
  func.func @kernel(%arg0: i32, %arg1: memref<2x2xf32, #tpu.memory_space<smem>>, %arg2: memref<2x6x256xf32, #tpu.memory_space<vmem>>, %arg3: memref<2x6x256xf32, #tpu.memory_space<vmem>>, %arg4: memref<2x256x256xbf16, #tpu.memory_space<vmem>>, %arg5: memref<2x256x256xbf16, #tpu.memory_space<vmem>>, %arg6: memref<2x6x256xf32, #tpu.memory_space<vmem>>, %arg7: memref<2x6x256xf32, #tpu.memory_space<vmem>>) attributes {dimension_semantics = [#tpu.dimension_semantics<arbitrary>], iteration_bounds = array<i64: 1>, scalar_prefetch = 0 : i64, scratch_operands = 0 : i64, tpu.core_type = #tpu.core_type<tc>, window_params = [{transform_indices = @transform_0, window_bounds = array<i64: 2, 2>}, {transform_indices = @transform_1, window_bounds = array<i64: 2, 6, 256>}, {transform_indices = @transform_2, window_bounds = array<i64: 2, 6, 256>}, {transform_indices = @transform_3, window_bounds = array<i64: 2, 256, 256>}, {transform_indices = @transform_4, window_bounds = array<i64: 2, 256, 256>}, {transform_indices = @transform_5, window_bounds = array<i64: 2, 6, 256>}, {transform_indices = @transform_6, window_bounds = array<i64: 2, 6, 256>}]} {
    %c2_i32 = arith.constant 2 : i32
    %0 = arith.muli %arg0, %c2_i32 : i32
    %c0_i32 = arith.constant 0 : i32
    %1 = arith.addi %0, %c0_i32 : i32
    %2 = arith.index_cast %1 : i32 to index
    %c0 = arith.constant 0 : index
    %3 = memref.load %arg1[%2, %c0] : memref<2x2xf32, #tpu.memory_space<smem>>
    %c0_i32_0 = arith.constant 0 : i32
    %4 = arith.addi %0, %c0_i32_0 : i32
    %5 = arith.index_cast %4 : i32 to index
    %c1 = arith.constant 1 : index
    %6 = memref.load %arg1[%5, %c1] : memref<2x2xf32, #tpu.memory_space<smem>>
    %c0_1 = arith.constant 0 : index
    %c0_2 = arith.constant 0 : index
    %c0_3 = arith.constant 0 : index
    %7 = vector.load %arg2[%c0_1, %c0_2, %c0_3] : memref<2x6x256xf32, #tpu.memory_space<vmem>>, vector<1x6x256xf32>
    %8 = vector.shape_cast %7 : vector<1x6x256xf32> to vector<6x256xf32>
    %9 = vector.broadcast %3 : f32 to vector<6x256xf32>
    %10 = arith.mulf %8, %9 : vector<6x256xf32>
    %11 = vector.broadcast %6 : f32 to vector<6x256xf32>
    %12 = arith.addf %10, %11 : vector<6x256xf32>
    %cst = arith.constant 0.000000e+00 : f32
    %cst_4 = arith.constant 1.000000e+00 : f32
    %13 = vector.broadcast %cst : f32 to vector<6x256xf32>
    %14 = arith.maximumf %13, %12 : vector<6x256xf32>
    %15 = vector.broadcast %cst_4 : f32 to vector<6x256xf32>
    %16 = arith.minimumf %15, %14 : vector<6x256xf32>
    %17 = arith.truncf %16 : vector<6x256xf32> to vector<6x256xbf16>
    %c0_5 = arith.constant 0 : index
    %c0_6 = arith.constant 0 : index
    %c0_7 = arith.constant 0 : index
    %18 = vector.load %arg4[%c0_5, %c0_6, %c0_7] : memref<2x256x256xbf16, #tpu.memory_space<vmem>>, vector<1x256x256xbf16>
    %19 = vector.shape_cast %18 : vector<1x256x256xbf16> to vector<256x256xbf16>
    %cst_8 = arith.constant dense<0.000000e+00> : vector<6x256xf32>
    %20 = tpu.matmul %17, %19, %cst_8 {dimension_numbers = #tpu.dot_dimension_numbers<[1], [0], [0], [1], [0, 0, 1, 1], [], []>} : vector<6x256xbf16>, vector<256x256xbf16>, vector<6x256xf32> -> vector<6x256xf32>
    %c0_9 = arith.constant 0 : index
    %c0_10 = arith.constant 0 : index
    %c0_11 = arith.constant 0 : index
    %21 = vector.load %arg6[%c0_9, %c0_10, %c0_11] : memref<2x6x256xf32, #tpu.memory_space<vmem>>, vector<1x6x256xf32>
    %22 = vector.shape_cast %21 : vector<1x6x256xf32> to vector<6x256xf32>
    %23 = vector.shape_cast %20 : vector<6x256xf32> to vector<1x6x256xf32>
    tpu.vector_store %arg6[%c0_9, %c0_10, %c0_11], %23 {strides = array<i32>} : memref<2x6x256xf32, #tpu.memory_space<vmem>>, vector<1x6x256xf32>,
    %c0_12 = arith.constant 0 : index
    %c0_13 = arith.constant 0 : index
    %c0_14 = arith.constant 0 : index
    %24 = vector.load %arg3[%c0_12, %c0_13, %c0_14] : memref<2x6x256xf32, #tpu.memory_space<vmem>>, vector<1x6x256xf32>
    %25 = vector.shape_cast %24 : vector<1x6x256xf32> to vector<6x256xf32>
    %26 = arith.truncf %25 : vector<6x256xf32> to vector<6x256xbf16>
    %c0_15 = arith.constant 0 : index
    %c0_16 = arith.constant 0 : index
    %c0_17 = arith.constant 0 : index
    %27 = vector.load %arg5[%c0_15, %c0_16, %c0_17] : memref<2x256x256xbf16, #tpu.memory_space<vmem>>, vector<1x256x256xbf16>
    %28 = vector.shape_cast %27 : vector<1x256x256xbf16> to vector<256x256xbf16>
    %cst_18 = arith.constant dense<0.000000e+00> : vector<6x256xf32>
    %29 = tpu.matmul %26, %28, %cst_18 {dimension_numbers = #tpu.dot_dimension_numbers<[1], [0], [0], [1], [0, 0, 1, 1], [], []>} : vector<6x256xbf16>, vector<256x256xbf16>, vector<6x256xf32> -> vector<6x256xf32>
    %c0_19 = arith.constant 0 : index
    %c0_20 = arith.constant 0 : index
    %c0_21 = arith.constant 0 : index
    %30 = vector.load %arg7[%c0_19, %c0_20, %c0_21] : memref<2x6x256xf32, #tpu.memory_space<vmem>>, vector<1x6x256xf32>
    %31 = vector.shape_cast %30 : vector<1x6x256xf32> to vector<6x256xf32>
    %32 = vector.shape_cast %29 : vector<6x256xf32> to vector<1x6x256xf32>
    tpu.vector_store %arg7[%c0_19, %c0_20, %c0_21], %32 {strides = array<i32>} : memref<2x6x256xf32, #tpu.memory_space<vmem>>, vector<1x6x256xf32>,
    %c1_i32 = arith.constant 1 : i32
    %33 = arith.addi %0, %c1_i32 : i32
    %34 = arith.index_cast %33 : i32 to index
    %c0_22 = arith.constant 0 : index
    %35 = memref.load %arg1[%34, %c0_22] : memref<2x2xf32, #tpu.memory_space<smem>>
    %c1_i32_23 = arith.constant 1 : i32
    %36 = arith.addi %0, %c1_i32_23 : i32
    %37 = arith.index_cast %36 : i32 to index
    %c1_24 = arith.constant 1 : index
    %38 = memref.load %arg1[%37, %c1_24] : memref<2x2xf32, #tpu.memory_space<smem>>
    %c1_25 = arith.constant 1 : index
    %c0_26 = arith.constant 0 : index
    %c0_27 = arith.constant 0 : index
    %39 = vector.load %arg2[%c1_25, %c0_26, %c0_27] : memref<2x6x256xf32, #tpu.memory_space<vmem>>, vector<1x6x256xf32>
    %40 = vector.shape_cast %39 : vector<1x6x256xf32> to vector<6x256xf32>
    %41 = vector.broadcast %35 : f32 to vector<6x256xf32>
    %42 = arith.mulf %40, %41 : vector<6x256xf32>
    %43 = vector.broadcast %38 : f32 to vector<6x256xf32>
    %44 = arith.addf %42, %43 : vector<6x256xf32>
    %cst_28 = arith.constant 0.000000e+00 : f32
    %cst_29 = arith.constant 1.000000e+00 : f32
    %45 = vector.broadcast %cst_28 : f32 to vector<6x256xf32>
    %46 = arith.maximumf %45, %44 : vector<6x256xf32>
    %47 = vector.broadcast %cst_29 : f32 to vector<6x256xf32>
    %48 = arith.minimumf %47, %46 : vector<6x256xf32>
    %49 = arith.truncf %48 : vector<6x256xf32> to vector<6x256xbf16>
    %c1_30 = arith.constant 1 : index
    %c0_31 = arith.constant 0 : index
    %c0_32 = arith.constant 0 : index
    %50 = vector.load %arg4[%c1_30, %c0_31, %c0_32] : memref<2x256x256xbf16, #tpu.memory_space<vmem>>, vector<1x256x256xbf16>
    %51 = vector.shape_cast %50 : vector<1x256x256xbf16> to vector<256x256xbf16>
    %cst_33 = arith.constant dense<0.000000e+00> : vector<6x256xf32>
    %52 = tpu.matmul %49, %51, %cst_33 {dimension_numbers = #tpu.dot_dimension_numbers<[1], [0], [0], [1], [0, 0, 1, 1], [], []>} : vector<6x256xbf16>, vector<256x256xbf16>, vector<6x256xf32> -> vector<6x256xf32>
    %c1_34 = arith.constant 1 : index
    %c0_35 = arith.constant 0 : index
    %c0_36 = arith.constant 0 : index
    %53 = vector.load %arg6[%c1_34, %c0_35, %c0_36] : memref<2x6x256xf32, #tpu.memory_space<vmem>>, vector<1x6x256xf32>
    %54 = vector.shape_cast %53 : vector<1x6x256xf32> to vector<6x256xf32>
    %55 = vector.shape_cast %52 : vector<6x256xf32> to vector<1x6x256xf32>
    tpu.vector_store %arg6[%c1_34, %c0_35, %c0_36], %55 {strides = array<i32>} : memref<2x6x256xf32, #tpu.memory_space<vmem>>, vector<1x6x256xf32>,
    %c1_37 = arith.constant 1 : index
    %c0_38 = arith.constant 0 : index
    %c0_39 = arith.constant 0 : index
    %56 = vector.load %arg3[%c1_37, %c0_38, %c0_39] : memref<2x6x256xf32, #tpu.memory_space<vmem>>, vector<1x6x256xf32>
    %57 = vector.shape_cast %56 : vector<1x6x256xf32> to vector<6x256xf32>
    %58 = arith.truncf %57 : vector<6x256xf32> to vector<6x256xbf16>
    %c1_40 = arith.constant 1 : index
    %c0_41 = arith.constant 0 : index
    %c0_42 = arith.constant 0 : index
    %59 = vector.load %arg5[%c1_40, %c0_41, %c0_42] : memref<2x256x256xbf16, #tpu.memory_space<vmem>>, vector<1x256x256xbf16>
    %60 = vector.shape_cast %59 : vector<1x256x256xbf16> to vector<256x256xbf16>
    %cst_43 = arith.constant dense<0.000000e+00> : vector<6x256xf32>
    %61 = tpu.matmul %58, %60, %cst_43 {dimension_numbers = #tpu.dot_dimension_numbers<[1], [0], [0], [1], [0, 0, 1, 1], [], []>} : vector<6x256xbf16>, vector<256x256xbf16>, vector<6x256xf32> -> vector<6x256xf32>
    %c1_44 = arith.constant 1 : index
    %c0_45 = arith.constant 0 : index
    %c0_46 = arith.constant 0 : index
    %62 = vector.load %arg7[%c1_44, %c0_45, %c0_46] : memref<2x6x256xf32, #tpu.memory_space<vmem>>, vector<1x6x256xf32>
    %63 = vector.shape_cast %62 : vector<1x6x256xf32> to vector<6x256xf32>
    %64 = vector.shape_cast %61 : vector<6x256xf32> to vector<1x6x256xf32>
    tpu.vector_store %arg7[%c1_44, %c0_45, %c0_46], %64 {strides = array<i32>} : memref<2x6x256xf32, #tpu.memory_space<vmem>>, vector<1x6x256xf32>,
    return
  }
  func.func @transform_0(%arg0: i32) -> (i32, i32) {
    %c0_i32 = arith.constant 0 : i32
    %c0_i32_0 = arith.constant 0 : i32
    %c0_i32_1 = arith.constant 0 : i32
    return %c0_i32, %c0_i32_0 : i32, i32
  }
  func.func @transform_1(%arg0: i32) -> (i32, i32, i32) {
    %c0_i32 = arith.constant 0 : i32
    %c0_i32_0 = arith.constant 0 : i32
    %c0_i32_1 = arith.constant 0 : i32
    return %arg0, %c0_i32, %c0_i32_0 : i32, i32, i32
  }
  func.func @transform_2(%arg0: i32) -> (i32, i32, i32) {
    %c0_i32 = arith.constant 0 : i32
    %c0_i32_0 = arith.constant 0 : i32
    %c0_i32_1 = arith.constant 0 : i32
    return %arg0, %c0_i32, %c0_i32_0 : i32, i32, i32
  }
  func.func @transform_3(%arg0: i32) -> (i32, i32, i32) {
    %c0_i32 = arith.constant 0 : i32
    %c0_i32_0 = arith.constant 0 : i32
    %c0_i32_1 = arith.constant 0 : i32
    return %arg0, %c0_i32, %c0_i32_0 : i32, i32, i32
  }
  func.func @transform_4(%arg0: i32) -> (i32, i32, i32) {
    %c0_i32 = arith.constant 0 : i32
    %c0_i32_0 = arith.constant 0 : i32
    %c0_i32_1 = arith.constant 0 : i32
    return %arg0, %c0_i32, %c0_i32_0 : i32, i32, i32
  }
  func.func @transform_5(%arg0: i32) -> (i32, i32, i32) {
    %c0_i32 = arith.constant 0 : i32
    %c0_i32_0 = arith.constant 0 : i32
    %c0_i32_1 = arith.constant 0 : i32
    return %arg0, %c0_i32, %c0_i32_0 : i32, i32, i32
  }
  func.func @transform_6(%arg0: i32) -> (i32, i32, i32) {
    %c0_i32 = arith.constant 0 : i32
    %c0_i32_0 = arith.constant 0 : i32
    %c0_i32_1 = arith.constant 0 : i32
    return %arg0, %c0_i32, %c0_i32_0 : i32, i32, i32
  }
}

</mosaic_0001>

<bundles_post_ra>
// kernel: tpu_custom_call.1
= control target key start
LH: loop header
LB: loop body
LE: loop exit
PB: predicated region body
PF: predicated region fallthrough
CT: control target
= control target key end

     0   :  { %12 = vsyncpa [#allocation4], 0  ;;  %s1595_s0 = inlined_call_operand.vmem [shape: f32[2,2], index: 0, kind: input, shape index: {}]   ;;  %s1596_s1 = inlined_call_operand.vmem [shape: f32[2,6,256], index: 1, kind: input, shape index: {}]   ;;  %s1597_s2 = inlined_call_operand.vmem [shape: f32[2,6,256], index: 2, kind: input, shape index: {}]   ;;  %s1598_s3 = inlined_call_operand.hbm [shape: bf16[2,256,256], index: 3, kind: input, shape index: {}]   ;;  %s1599_s4 = inlined_call_operand.hbm [shape: bf16[2,256,256], index: 4, kind: input, shape index: {}]   ;;  %s1600_s5 = inlined_call_operand.vmem [shape: f32[2,6,256], index: 5, kind: output, shape index: {0}]   ;;  %s1601_s6 = inlined_call_operand.vmem [shape: f32[2,6,256], index: 6, kind: output, shape index: {1}]  }
   0x1   :  { %13 = vsyncpa [#allocation3], 0  ;;  %s21_s23 = sshll.u32 %s1595_s0, 4  ;;  %s22_s23 = int_to_ptr.vmem [resolvable:$true] %s21_s23 }
   0x2   :  { %14 = vsyncpa [#allocation7], 0  ;;  %s1402_s24 = scalar_lea.vmem %s22_s23, 32  ;;  %p1407_p1 = scmp.lt.s32.totalorder %s22_s23, %s22_s23 }
   0x3   :  { %p1403_p0 = scmp.ne.s32.totalorder %s22_s23, %s1402_s24  ;;  %p1408_p2 = scmp.lt.s32.totalorder %s1402_s24, %s1402_s24 }
   0x5   :  { %p1409_p3 = por %p1408_p2, %p1407_p1 }
   0x7   :  { %p1410_p4 = pnand %p1409_p3, %p1403_p0 }
   0x9   :  { %1413 = shalt.err (!%p1410_p4)
}
   0xa   :  { %s1464_s25 = smov [#allocation2]   ;;  %s1465_s26 = smov [#allocation5]  }
   0xb   :  { %24 = dma.vmem_to_smem %s22_s23, 32, %s1464_s25, [#allocation4]  }
   0xc   :  { %s34_s27 = sshll.u32 %s1465_s26, 4  ;;  %s1414_s30 = scalar_lea.hbm %s1598_s3, 8192  ;;  %s35_s27 = int_to_ptr.vmem [resolvable:$true] %s34_s27 }
   0xd   :  { %p1415_p5 = scmp.ne.s32.totalorder %s1598_s3, %s1414_s30  ;;  %p1418_p6 = scmp.lt.u32.totalorder %s1414_s30, %s1598_s3 }
   0xf   :  { %p1420_p7 = pnand %p1418_p6, %p1415_p5 }
  0x11   :  { %1423 = shalt.err (!%p1420_p7)
}
  0x12   :  { %s1424_s10 = scalar_lea.vmem %s35_s27, 8192  ;;  %p1429_p9 = scmp.lt.s32.totalorder %s35_s27, %s35_s27 }
  0x13   :  { %p1425_p8 = scmp.ne.s32.totalorder %s35_s27, %s1424_s10  ;;  %p1430_p10 = scmp.lt.s32.totalorder %s1424_s10, %s1424_s10 }
  0x15   :  { %p1431_p11 = por %p1430_p10, %p1429_p9 }
  0x17   :  { %p1432_p12 = pnand %p1431_p11, %p1425_p8 }
  0x19   :  { %1435 = shalt.err (!%p1432_p12)
}
  0x1a   :  { %s1466_s11 = smov 128   ;;  %s1467_s12 = smov 8  }
  0x1b   :  { %40 = dma.hbm_to_vmem [thread:$0]  %s1598_s3, 8192, %s35_s27, [#allocation3], %s1466_s11, %s1466_s11, %s1467_s12  }
  0x1c   :  { %s1468_s15 = smov [#allocation6]   ;;  %s1436_s19 = scalar_lea.hbm %s1599_s4, 8192 }
  0x1d   :  { %s46_s16 = sshll.u32 %s1468_s15, 4  ;;  %p1437_p13 = scmp.ne.s32.totalorder %s1599_s4, %s1436_s19  ;;  %s47_s16 = int_to_ptr.vmem [resolvable:$true] %s46_s16 }
  0x1e   :  { %p1440_p0 = scmp.lt.u32.totalorder %s1436_s19, %s1599_s4 }
  0x20   :  { %p1442_p1 = pnand %p1440_p0, %p1437_p13 }
  0x22   :  { %1445 = shalt.err (!%p1442_p1)
}
  0x23   :  { %s1446_s24 = scalar_lea.vmem %s47_s16, 8192  ;;  %p1451_p3 = scmp.lt.s32.totalorder %s47_s16, %s47_s16 }
  0x24   :  { %p1447_p2 = scmp.ne.s32.totalorder %s47_s16, %s1446_s24  ;;  %p1452_p4 = scmp.lt.s32.totalorder %s1446_s24, %s1446_s24 }
  0x26   :  { %p1453_p5 = por %p1452_p4, %p1451_p3 }
  0x28   :  { %p1454_p6 = pnand %p1453_p5, %p1447_p2 }
  0x2a   :  { %1457 = shalt.err (!%p1454_p6)
}
  0x2b   :  { %52 = dma.hbm_to_vmem [thread:$0]  %s1599_s4, 8192, %s47_s16, [#allocation7], %s1466_s11, %s1466_s11, %s1467_s12  }
  0x2c   :  { %1458 = dma.done.wait [#allocation4], 32  }
  0x2d   :  { %1459 = vsyncadd [#allocation4], 4294967264 }
  0x2e   :  { %1460 = dma.done.wait [#allocation3], 8192  }
  0x2f   :  { %1461 = vsyncadd [#allocation3], 4294959104 }
  0x30   :  { %1462 = dma.done.wait [#allocation7], 8192  }
  0x31   :  { %1463 = vsyncadd [#allocation7], 4294959104 }
  0x32   :  { %62 = sfence }
  0x33   :  { %v1210_v0 = vld [vmem:[#allocation5 + $0x4] ss:$8 sps:$4 sm:$0xff]   ;;  %v1214_v2 = vld [vmem:[#allocation5] ss:$8 sps:$4 sm:$0xff]   ;;  %v1216_v4 = vld [vmem:[#allocation5 + $0x14] ss:$8 sps:$4 sm:$0xff]  }
  0x34   :  { %v1212_v1 = vld [vmem:[#allocation6 + $0x4] ss:$8 sps:$4 sm:$0xff]   ;;  %274 = vmatprep.subr.bf16.mxu0 %v1210_v0  ;;  %v1215_v3 = vld [vmem:[#allocation6] ss:$8 sps:$4 sm:$0xff]   ;;  %v1218_v5 = vld [vmem:[#allocation6 + $0x14] ss:$8 sps:$4 sm:$0xff]  }
  0x35   :  { %513 = vmatprep.subr.bf16.mxu1 %v1212_v1  ;;  %275 = vmatpush1.bf16.msra.mxu0 %v1214_v2  ;;  %v1220_v6 = vld [vmem:[#allocation5 + $0x10] ss:$8 sps:$4 sm:$0xff]   ;;  %v1222_v8 = vld [vmem:[#allocation5 + $0x24] ss:$8 sps:$4 sm:$0xff]   ;;  %v1226_v10 = vld [vmem:[#allocation5 + $0x20] ss:$8 sps:$4 sm:$0xff]  }
  0x36   :  { %514 = vmatpush1.bf16.msra.mxu1 %v1215_v3  ;;  %276 = vmatprep.subr.bf16.mxu0 %v1216_v4  ;;  %v1221_v7 = vld [vmem:[#allocation6 + $0x10] ss:$8 sps:$4 sm:$0xff]   ;;  %v1224_v9 = vld [vmem:[#allocation6 + $0x24] ss:$8 sps:$4 sm:$0xff]   ;;  %v1227_v11 = vld [vmem:[#allocation6 + $0x20] ss:$8 sps:$4 sm:$0xff]  }
  0x37   :  { %515 = vmatprep.subr.bf16.mxu1 %v1218_v5  ;;  %v1228_v12 = vld [vmem:[#allocation5 + $0x34] ss:$8 sps:$4 sm:$0xff]   ;;  %v1232_v14 = vld [vmem:[#allocation5 + $0x30] ss:$8 sps:$4 sm:$0xff]   ;;  %v1234_v16 = vld [vmem:[#allocation5 + $0x44] ss:$8 sps:$4 sm:$0xff]  }
  0x38   :  { %v1230_v13 = vld [vmem:[#allocation6 + $0x34] ss:$8 sps:$4 sm:$0xff]   ;;  %v1233_v15 = vld [vmem:[#allocation6 + $0x30] ss:$8 sps:$4 sm:$0xff]   ;;  %v1236_v17 = vld [vmem:[#allocation6 + $0x44] ss:$8 sps:$4 sm:$0xff]  }
  0x39   :  { %277 = vmatpush1.bf16.msra.mxu0 %v1220_v6  ;;  %v1238_v18 = vld [vmem:[#allocation5 + $0x40] ss:$8 sps:$4 sm:$0xff]   ;;  %v1240_v20 = vld [vmem:[#allocation5 + $0x54] ss:$8 sps:$4 sm:$0xff]   ;;  %v1244_v22 = vld [vmem:[#allocation5 + $0x50] ss:$8 sps:$4 sm:$0xff]  }
  0x3a   :  { %516 = vmatpush1.bf16.msra.mxu1 %v1221_v7  ;;  %278 = vmatprep.subr.bf16.mxu0 %v1222_v8  ;;  %v1239_v19 = vld [vmem:[#allocation6 + $0x40] ss:$8 sps:$4 sm:$0xff]   ;;  %v1242_v21 = vld [vmem:[#allocation6 + $0x54] ss:$8 sps:$4 sm:$0xff]   ;;  %v1245_v23 = vld [vmem:[#allocation6 + $0x50] ss:$8 sps:$4 sm:$0xff]  }
  0x3b   :  { %517 = vmatprep.subr.bf16.mxu1 %v1224_v9  ;;  %v1246_v24 = vld [vmem:[#allocation5 + $0x64] ss:$8 sps:$4 sm:$0xff]   ;;  %v1250_v26 = vld [vmem:[#allocation5 + $0x60] ss:$8 sps:$4 sm:$0xff]   ;;  %v1252_v28 = vld [vmem:[#allocation5 + $0x74] ss:$8 sps:$4 sm:$0xff]  }
  0x3c   :  { %v1248_v25 = vld [vmem:[#allocation6 + $0x64] ss:$8 sps:$4 sm:$0xff]   ;;  %v1251_v27 = vld [vmem:[#allocation6 + $0x60] ss:$8 sps:$4 sm:$0xff]   ;;  %v1254_v29 = vld [vmem:[#allocation6 + $0x74] ss:$8 sps:$4 sm:$0xff]  }
  0x3d   :  { %279 = vmatpush1.bf16.msra.mxu0 %v1226_v10  ;;  %v1256_v30 = vld [vmem:[#allocation5 + $0x70] ss:$8 sps:$4 sm:$0xff]   ;;  %v1258_v32 = vld [vmem:[#allocation5 + $0x84] ss:$8 sps:$4 sm:$0xff]   ;;  %v1262_v34 = vld [vmem:[#allocation5 + $0x80] ss:$8 sps:$4 sm:$0xff]  }
  0x3e   :  { %518 = vmatpush1.bf16.msra.mxu1 %v1227_v11  ;;  %280 = vmatprep.subr.bf16.mxu0 %v1228_v12  ;;  %v1257_v31 = vld [vmem:[#allocation6 + $0x70] ss:$8 sps:$4 sm:$0xff]   ;;  %v1260_v33 = vld [vmem:[#allocation6 + $0x84] ss:$8 sps:$4 sm:$0xff]   ;;  %v1263_v35 = vld [vmem:[#allocation6 + $0x80] ss:$8 sps:$4 sm:$0xff]  }
  0x3f   :  { %519 = vmatprep.subr.bf16.mxu1 %v1230_v13  ;;  %v1264_v36 = vld [vmem:[#allocation5 + $0x94] ss:$8 sps:$4 sm:$0xff]   ;;  %s1531_s4 = sld [smem:[#allocation2]]  ;;  %v1268_v38 = vld [vmem:[#allocation5 + $0x90] ss:$8 sps:$4 sm:$0xff]   ;;  %s1533_s26 = sld [smem:[#allocation2 + $0x1]] }
  0x40   :  { %v1266_v37 = vld [vmem:[#allocation6 + $0x94] ss:$8 sps:$4 sm:$0xff]   ;;  %v1269_v39 = vld [vmem:[#allocation6 + $0x90] ss:$8 sps:$4 sm:$0xff]   ;;  %v1270_v40 = vld [vmem:[#allocation5 + $0xa4] ss:$8 sps:$4 sm:$0xff]  }
  0x41   :  { %281 = vmatpush1.bf16.msra.mxu0 %v1232_v14  ;;  %v1272_v41 = vld [vmem:[#allocation6 + $0xa4] ss:$8 sps:$4 sm:$0xff]   ;;  %v1274_v42 = vld [vmem:[#allocation5 + $0xa0] ss:$8 sps:$4 sm:$0xff]   ;;  %v1276_v44 = vld [vmem:[#allocation5 + $0xb4] ss:$8 sps:$4 sm:$0xff]  }
  0x42   :  { %520 = vmatpush1.bf16.msra.mxu1 %v1233_v15  ;;  %282 = vmatprep.subr.bf16.mxu0 %v1234_v16  ;;  %v1275_v43 = vld [vmem:[#allocation6 + $0xa0] ss:$8 sps:$4 sm:$0xff]   ;;  %v1278_v45 = vld [vmem:[#allocation6 + $0xb4] ss:$8 sps:$4 sm:$0xff]   ;;  %v1280_v47 = vld [vmem:[#allocation5 + $0xb0] ss:$8 sps:$4 sm:$0xff]  }
  0x43   :  { %521 = vmatprep.subr.bf16.mxu1 %v1236_v17  ;;  %v1281_v48 = vld [vmem:[#allocation6 + $0xb0] ss:$8 sps:$4 sm:$0xff]   ;;  %v1282_v49 = vld [vmem:[#allocation5 + $0xc4] ss:$8 sps:$4 sm:$0xff]   ;;  %v1286_v58 = vld [vmem:[#allocation5 + $0xc0] ss:$8 sps:$4 sm:$0xff]  }
  0x44   :  { %v69_v50 = vld [vmem:[%s1596_s1 + $0x8] sm:$0x3f]  ;;  %v68_v53 = vld [vmem:[%s1596_s1] sm:$0x3f]  ;;  %v1288_v61 = vld [vmem:[#allocation5 + $0xd4] ss:$8 sps:$4 sm:$0xff]  }
  0x45   :  { %283 = vmatpush1.bf16.msra.mxu0 %v1238_v18  ;;  %v70_v46 = vstv %s1531_s4  ;;  %v73_v51 = vstv %s1533_s26  ;;  %v318_v52 = vld [vmem:[%s1597_s2 + $0x8] sm:$0x3f]  ;;  %v1290_v63 = vld [vmem:[#allocation6 + $0xd4] ss:$8 sps:$4 sm:$0xff]   ;;  %v1292_v1 = vld [vmem:[#allocation5 + $0xd0] ss:$8 sps:$4 sm:$0xff]  }
  0x46   :  { %522 = vmatpush1.bf16.msra.mxu1 %v1239_v19  ;;  %284 = vmatprep.subr.bf16.mxu0 %v1240_v20  ;;  %v72_v54 = vmul.f32 %v70_v46, %v69_v50  ;;  %v320_v55 = vpack.c.bf16 %v318_v52, %v318_v52  ;;  %v1284_v56 = vld [vmem:[#allocation6 + $0xc4] ss:$8 sps:$4 sm:$0xff]   ;;  %v1287_v59 = vld [vmem:[#allocation6 + $0xc0] ss:$8 sps:$4 sm:$0xff]   ;;  %v71_v60 = vmul.f32 %v70_v46, %v68_v53  ;;  %v1293_v2 = vld [vmem:[#allocation6 + $0xd0] ss:$8 sps:$4 sm:$0xff]  }
  0x47   :  { %523 = vmatprep.subr.bf16.mxu1 %v1242_v21  ;;  %v1294_v4 = vld [vmem:[#allocation5 + $0xe4] ss:$8 sps:$4 sm:$0xff]   ;;  %v1298_v7 = vld [vmem:[#allocation5 + $0xe0] ss:$8 sps:$4 sm:$0xff]   ;;  %v1300_v10 = vld [vmem:[#allocation5 + $0xf4] ss:$8 sps:$4 sm:$0xff]  }
  0x48   :  { %v75_v57 = vadd.f32 %v73_v51, %v72_v54  ;;  %545 = vmatprep.mubr.bf16.mxu1 %v320_v55  ;;  %v74_v3 = vadd.f32 %v73_v51, %v71_v60  ;;  %v1296_v6 = vld [vmem:[#allocation6 + $0xe4] ss:$8 sps:$4 sm:$0xff]   ;;  %v1299_v8 = vld [vmem:[#allocation6 + $0xe0] ss:$8 sps:$4 sm:$0xff]   ;;  %v1302_v11 = vld [vmem:[#allocation6 + $0xf4] ss:$8 sps:$4 sm:$0xff]  }
  0x49   :  { %285 = vmatpush1.bf16.msra.mxu0 %v1244_v22  ;;  %v1304_v12 = vld [vmem:[#allocation5 + $0xf0] ss:$8 sps:$4 sm:$0xff]   ;;  %v317_v15 = vld [vmem:[%s1597_s2] sm:$0x3f]  ;;  %v1314_v22 = vld [vmem:[#allocation5 + $0x114] ss:$8 sps:$4 sm:$0xff]  }
  0x4a   :  { %524 = vmatpush1.bf16.msra.mxu1 %v1245_v23  ;;  %286 = vmatprep.subr.bf16.mxu0 %v1246_v24  ;;  %v77_v62 = vmax.f32 %v75_v57, 0.0  ;;  %v76_v9 = vmax.f32 %v74_v3, 0.0  ;;  %v1305_v13 = vld [vmem:[#allocation6 + $0xf0] ss:$8 sps:$4 sm:$0xff]   ;;  %v1308_v16 = vld [vmem:[#allocation5 + $0x104] ss:$8 sps:$4 sm:$0xff]   ;;  %v319_v19 = vpack.c.bf16 %v317_v15, %v317_v15 }
  0x4b   :  { %525 = vmatprep.subr.bf16.mxu1 %v1248_v25  ;;  %v1311_v17 = vld [vmem:[#allocation6 + $0x104] ss:$8 sps:$4 sm:$0xff]   ;;  %v1306_v20 = vld [vmem:[#allocation5 + $0x100] ss:$8 sps:$4 sm:$0xff]   ;;  %v1317_v23 = vld [vmem:[#allocation6 + $0x114] ss:$8 sps:$4 sm:$0xff]  }
  0x4c   :  { %v79_v0 = vmin.f32 %v77_v62, 1.0  ;;  %v78_v14 = vmin.f32 %v76_v9, 1.0  ;;  %v1309_v21 = vld [vmem:[#allocation6 + $0x100] ss:$8 sps:$4 sm:$0xff]   ;;  %v1312_v24 = vld [vmem:[#allocation5 + $0x110] ss:$8 sps:$4 sm:$0xff]  }
  0x4d   :  { %287 = vmatpush1.bf16.msra.mxu0 %v1250_v26  ;;  %v1315_v25 = vld [vmem:[#allocation6 + $0x110] ss:$8 sps:$4 sm:$0xff]   ;;  %v1320_v26 = vld [vmem:[#allocation5 + $0x124] ss:$8 sps:$4 sm:$0xff]   ;;  %s1549_s10 = sld [smem:[#allocation2 + $0x80]]  ;;  %s1551_s11 = sld [smem:[#allocation2 + $0x81]] }
  0x4e   :  { %526 = vmatpush1.bf16.msra.mxu1 %v1251_v27  ;;  %288 = vmatprep.subr.bf16.mxu0 %v1252_v28  ;;  %v81_v5 = vpack.c.bf16 %v79_v0, %v79_v0  ;;  %v80_v18 = vpack.c.bf16 %v78_v14, %v78_v14  ;;  %v1323_v27 = vld [vmem:[#allocation6 + $0x124] ss:$8 sps:$4 sm:$0xff]   ;;  %v1318_v28 = vld [vmem:[#allocation5 + $0x120] ss:$8 sps:$4 sm:$0xff]   ;;  %v1350_v52 = vld [vmem:[#allocation5 + $0x174] ss:$8 sps:$4 sm:$0xff]  }
  0x4f   :  { %527 = vmatprep.subr.bf16.mxu1 %v1254_v29  ;;  %v1321_v29 = vld [vmem:[#allocation6 + $0x120] ss:$8 sps:$4 sm:$0xff]   ;;  %v1353_v53 = vld [vmem:[#allocation6 + $0x174] ss:$8 sps:$4 sm:$0xff]   ;;  %v1348_v55 = vld [vmem:[#allocation5 + $0x170] ss:$8 sps:$4 sm:$0xff]  }
  0x50   :  { %306 = vmatprep.mubr.bf16.mxu0 %v81_v5  ;;  %v1357_v62 = vld [vmem:[#allocation6 + $0x180] ss:$8 sps:$4 sm:$0xff]   ;;  %v1362_v0 = vld [vmem:[#allocation5 + $0x194] ss:$8 sps:$4 sm:$0xff]   ;;  %v1363_v3 = vld [vmem:[#allocation6 + $0x190] ss:$8 sps:$4 sm:$0xff]  }
  0x51   :  { %289 = vmatpush1.bf16.msra.mxu0 %v1256_v30  ;;  %v1326_v30 = vld [vmem:[#allocation5 + $0x134] ss:$8 sps:$4 sm:$0xff]   ;;  %v1371_v5 = vld [vmem:[#allocation6 + $0x1a4] ss:$8 sps:$4 sm:$0xff]  }
  0x52   :  { %528 = vmatpush1.bf16.msra.mxu1 %v1257_v31  ;;  %290 = vmatprep.subr.bf16.mxu0 %v1258_v32  ;;  %v1329_v31 = vld [vmem:[#allocation6 + $0x134] ss:$8 sps:$4 sm:$0xff]   ;;  %v1324_v32 = vld [vmem:[#allocation5 + $0x130] ss:$8 sps:$4 sm:$0xff]   ;;  %v1383_v14 = vld [vmem:[#allocation6 + $0x1c4] ss:$8 sps:$4 sm:$0xff]  }
  0x53   :  { %529 = vmatprep.subr.bf16.mxu1 %v1260_v33  ;;  %v1327_v33 = vld [vmem:[#allocation6 + $0x130] ss:$8 sps:$4 sm:$0xff]   ;;  %v567_v46 = vstv %s1551_s11  ;;  %v1377_v9 = vld [vmem:[#allocation6 + $0x1b4] ss:$8 sps:$4 sm:$0xff]  }
  0x55   :  { %291 = vmatpush1.bf16.msra.mxu0 %v1262_v34  ;;  %v1332_v34 = vld [vmem:[#allocation5 + $0x144] ss:$8 sps:$4 sm:$0xff]  }
  0x56   :  { %530 = vmatpush1.bf16.msra.mxu1 %v1263_v35  ;;  %292 = vmatprep.subr.bf16.mxu0 %v1264_v36  ;;  %v1335_v35 = vld [vmem:[#allocation6 + $0x144] ss:$8 sps:$4 sm:$0xff]   ;;  %v1330_v36 = vld [vmem:[#allocation5 + $0x140] ss:$8 sps:$4 sm:$0xff]  }
  0x57   :  { %531 = vmatprep.subr.bf16.mxu1 %v1266_v37  ;;  %v1333_v37 = vld [vmem:[#allocation6 + $0x140] ss:$8 sps:$4 sm:$0xff]  }
  0x59   :  { %293 = vmatpush1.bf16.msra.mxu0 %v1268_v38  ;;  %v1338_v38 = vld [vmem:[#allocation5 + $0x154] ss:$8 sps:$4 sm:$0xff]  }
  0x5a   :  { %532 = vmatpush1.bf16.msra.mxu1 %v1269_v39  ;;  %294 = vmatprep.subr.bf16.mxu0 %v1270_v40  ;;  %v1341_v39 = vld [vmem:[#allocation6 + $0x154] ss:$8 sps:$4 sm:$0xff]   ;;  %v1336_v40 = vld [vmem:[#allocation5 + $0x150] ss:$8 sps:$4 sm:$0xff]  }
  0x5b   :  { %533 = vmatprep.subr.bf16.mxu1 %v1272_v41  ;;  %v1339_v41 = vld [vmem:[#allocation6 + $0x150] ss:$8 sps:$4 sm:$0xff]  }
  0x5d   :  { %295 = vmatpush1.bf16.msra.mxu0 %v1274_v42  ;;  %v1344_v42 = vld [vmem:[#allocation5 + $0x164] ss:$8 sps:$4 sm:$0xff]  }
  0x5e   :  { %534 = vmatpush1.bf16.msra.mxu1 %v1275_v43  ;;  %296 = vmatprep.subr.bf16.mxu0 %v1276_v44  ;;  %v1347_v43 = vld [vmem:[#allocation6 + $0x164] ss:$8 sps:$4 sm:$0xff]   ;;  %v564_v44 = vstv %s1549_s10 }
  0x5f   :  { %535 = vmatprep.subr.bf16.mxu1 %v1278_v45  ;;  %v1134_v45 = vld [vmem:[%s1596_s1 + $0x18] sm:$0x3f] }
  0x60   :  { %v566_v50 = vmul.f32 %v1134_v45, %v564_v44 }
  0x61   :  { %297 = vmatpush1.bf16.msra.mxu0 %v1280_v47  ;;  %v1170_v47 = vld [vmem:[%s1597_s2 + $0x18] sm:$0x3f] }
  0x62   :  { %536 = vmatpush1.bf16.msra.mxu1 %v1281_v48  ;;  %298 = vmatprep.subr.bf16.mxu0 %v1282_v49  ;;  %v1342_v48 = vld [vmem:[#allocation5 + $0x160] ss:$8 sps:$4 sm:$0xff]   ;;  %v817_v51 = vpack.c.bf16 %v1170_v47, %v1170_v47  ;;  %v569_v54 = vadd.f32 %v567_v46, %v566_v50 }
  0x63   :  { %537 = vmatprep.subr.bf16.mxu1 %v1284_v56  ;;  %v1345_v49 = vld [vmem:[#allocation6 + $0x160] ss:$8 sps:$4 sm:$0xff]   ;;  %v1351_v56 = vld [vmem:[#allocation6 + $0x170] ss:$8 sps:$4 sm:$0xff]  }
  0x64   :  { %v571_v57 = vmax.f32 %v569_v54, 0.0 }
  0x65   :  { %299 = vmatpush1.bf16.msra.mxu0 %v1286_v58  ;;  %v1356_v58 = vld [vmem:[#allocation5 + $0x184] ss:$8 sps:$4 sm:$0xff]  }
  0x66   :  { %538 = vmatpush1.bf16.msra.mxu1 %v1287_v59  ;;  %300 = vmatprep.subr.bf16.mxu0 %v1288_v61  ;;  %v1359_v59 = vld [vmem:[#allocation6 + $0x184] ss:$8 sps:$4 sm:$0xff]   ;;  %v573_v60 = vmin.f32 %v571_v57, 1.0  ;;  %v1354_v61 = vld [vmem:[#allocation5 + $0x180] ss:$8 sps:$4 sm:$0xff]  }
  0x67   :  { %539 = vmatprep.subr.bf16.mxu1 %v1290_v63 }
  0x68   :  { %v575_v63 = vpack.c.bf16 %v573_v60, %v573_v60 }
  0x69   :  { %301 = vmatpush1.bf16.msra.mxu0 %v1292_v1  ;;  %v1365_v1 = vld [vmem:[#allocation6 + $0x194] ss:$8 sps:$4 sm:$0xff]  }
  0x6a   :  { %540 = vmatpush1.bf16.msra.mxu1 %v1293_v2  ;;  %302 = vmatprep.subr.bf16.mxu0 %v1294_v4  ;;  %v1360_v2 = vld [vmem:[#allocation5 + $0x190] ss:$8 sps:$4 sm:$0xff]   ;;  %v1368_v4 = vld [vmem:[#allocation5 + $0x1a4] ss:$8 sps:$4 sm:$0xff]  }
  0x6b   :  { %541 = vmatprep.subr.bf16.mxu1 %v1296_v6  ;;  %v1366_v6 = vld [vmem:[#allocation5 + $0x1a0] ss:$8 sps:$4 sm:$0xff]  }
  0x6d   :  { %303 = vmatpush1.bf16.msra.mxu0 %v1298_v7  ;;  %v1369_v7 = vld [vmem:[#allocation6 + $0x1a0] ss:$8 sps:$4 sm:$0xff]  }
  0x6e   :  { %542 = vmatpush1.bf16.msra.mxu1 %v1299_v8  ;;  %304 = vmatprep.subr.bf16.mxu0 %v1300_v10  ;;  %v1374_v8 = vld [vmem:[#allocation5 + $0x1b4] ss:$8 sps:$4 sm:$0xff]   ;;  %v1372_v10 = vld [vmem:[#allocation5 + $0x1b0] ss:$8 sps:$4 sm:$0xff]  }
  0x6f   :  { %543 = vmatprep.subr.bf16.mxu1 %v1302_v11  ;;  %v1375_v11 = vld [vmem:[#allocation6 + $0x1b0] ss:$8 sps:$4 sm:$0xff]  }
  0x71   :  { %305 = vmatpush1.bf16.msra.mxu0 %v1304_v12  ;;  %v1133_v12 = vld [vmem:[%s1596_s1 + $0x10] sm:$0x3f] }
  0x72   :  { %544 = vmatpush1.bf16.msra.mxu1 %v1305_v13  ;;  %769 = vmatprep.subr.bf16.mxu0 %v1308_v16  ;;  %v1380_v13 = vld [vmem:[#allocation5 + $0x1c4] ss:$8 sps:$4 sm:$0xff]   ;;  %v565_v15 = vmul.f32 %v1133_v12, %v564_v44  ;;  %v1378_v16 = vld [vmem:[#allocation5 + $0x1c0] ss:$8 sps:$4 sm:$0xff]  }
  0x73   :  { %1011 = vmatprep.subr.bf16.mxu1 %v1311_v17  ;;  %v1381_v17 = vld [vmem:[#allocation6 + $0x1c0] ss:$8 sps:$4 sm:$0xff]  }
  0x74   :  { %307 = vmatmul.mubr.bf16.vlgmr.msra.gmra.mrb[0].mxu0 %v80_v18  ;;  %v1386_v18 = vld [vmem:[#allocation5 + $0x1d4] ss:$8 sps:$4 sm:$0xff]  }
  0x75   :  { %546 = vmatmul.mubr.bf16.vlgmr.msra.gmra.mrb[0].mxu1 %v319_v19  ;;  %770 = vmatpush1.bf16.msra.mxu0 %v1306_v20  ;;  %v1389_v19 = vld [vmem:[#allocation6 + $0x1d4] ss:$8 sps:$4 sm:$0xff]   ;;  %v568_v20 = vadd.f32 %v567_v46, %v565_v15 }
  0x76   :  { %1012 = vmatpush1.bf16.msra.mxu1 %v1309_v21  ;;  %771 = vmatprep.subr.bf16.mxu0 %v1314_v22  ;;  %v1384_v21 = vld [vmem:[#allocation5 + $0x1d0] ss:$8 sps:$4 sm:$0xff]  }
  0x77   :  { %1013 = vmatprep.subr.bf16.mxu1 %v1317_v23  ;;  %1043 = vmatprep.mubr.bf16.mxu1 %v817_v51  ;;  %v1387_v22 = vld [vmem:[#allocation6 + $0x1d0] ss:$8 sps:$4 sm:$0xff]   ;;  %v1392_v23 = vld [vmem:[#allocation5 + $0x1e4] ss:$8 sps:$4 sm:$0xff]  }
  0x78   :  { %801 = vmatprep.mubr.bf16.mxu0 %v575_v63 }
  0x79   :  { %772 = vmatpush1.bf16.msra.mxu0 %v1312_v24  ;;  %v1395_v24 = vld [vmem:[#allocation6 + $0x1e4] ss:$8 sps:$4 sm:$0xff]  }
  0x7a   :  { %1014 = vmatpush1.bf16.msra.mxu1 %v1315_v25  ;;  %773 = vmatprep.subr.bf16.mxu0 %v1320_v26  ;;  %v570_v25 = vmax.f32 %v568_v20, 0.0  ;;  %v1390_v26 = vld [vmem:[#allocation5 + $0x1e0] ss:$8 sps:$4 sm:$0xff]  }
  0x7b   :  { %1015 = vmatprep.subr.bf16.mxu1 %v1323_v27  ;;  %v1393_v27 = vld [vmem:[#allocation6 + $0x1e0] ss:$8 sps:$4 sm:$0xff]  }
  0x7d   :  { %774 = vmatpush1.bf16.msra.mxu0 %v1318_v28  ;;  %v1398_v28 = vld [vmem:[#allocation5 + $0x1f4] ss:$8 sps:$4 sm:$0xff]  }
  0x7e   :  { %1016 = vmatpush1.bf16.msra.mxu1 %v1321_v29  ;;  %775 = vmatprep.subr.bf16.mxu0 %v1326_v30  ;;  %v1401_v29 = vld [vmem:[#allocation6 + $0x1f4] ss:$8 sps:$4 sm:$0xff]   ;;  %v572_v30 = vmin.f32 %v570_v25, 1.0 }
  0x7f   :  { %1017 = vmatprep.subr.bf16.mxu1 %v1329_v31  ;;  %v1396_v31 = vld [vmem:[#allocation5 + $0x1f0] ss:$8 sps:$4 sm:$0xff]  }
  0x81   :  { %776 = vmatpush1.bf16.msra.mxu0 %v1324_v32  ;;  %v1399_v32 = vld [vmem:[#allocation6 + $0x1f0] ss:$8 sps:$4 sm:$0xff]  }
  0x82   :  { %1018 = vmatpush1.bf16.msra.mxu1 %v1327_v33  ;;  %777 = vmatprep.subr.bf16.mxu0 %v1332_v34  ;;  %v1169_v33 = vld [vmem:[%s1597_s2 + $0x10] sm:$0x3f]  ;;  %v574_v34 = vpack.c.bf16 %v572_v30, %v572_v30 }
  0x83   :  { %1019 = vmatprep.subr.bf16.mxu1 %v1335_v35  ;;  %v816_v35 = vpack.c.bf16 %v1169_v33, %v1169_v33 }
  0x85   :  { %778 = vmatpush1.bf16.msra.mxu0 %v1330_v36 }
  0x86   :  { %1020 = vmatpush1.bf16.msra.mxu1 %v1333_v37  ;;  %779 = vmatprep.subr.bf16.mxu0 %v1338_v38 }
  0x87   :  { %1021 = vmatprep.subr.bf16.mxu1 %v1341_v39 }
  0x89   :  { %780 = vmatpush1.bf16.msra.mxu0 %v1336_v40 }
  0x8a   :  { %1022 = vmatpush1.bf16.msra.mxu1 %v1339_v41  ;;  %781 = vmatprep.subr.bf16.mxu0 %v1344_v42 }
  0x8b   :  { %1023 = vmatprep.subr.bf16.mxu1 %v1347_v43 }
  0x8d   :  { %782 = vmatpush1.bf16.msra.mxu0 %v1342_v48 }
  0x8e   :  { %1024 = vmatpush1.bf16.msra.mxu1 %v1345_v49  ;;  %783 = vmatprep.subr.bf16.mxu0 %v1350_v52 }
  0x8f   :  { %1025 = vmatprep.subr.bf16.mxu1 %v1353_v53 }
  0x91   :  { %784 = vmatpush1.bf16.msra.mxu0 %v1348_v55 }
  0x92   :  { %1026 = vmatpush1.bf16.msra.mxu1 %v1351_v56  ;;  %785 = vmatprep.subr.bf16.mxu0 %v1356_v58 }
  0x93   :  { %1027 = vmatprep.subr.bf16.mxu1 %v1359_v59 }
  0x95   :  { %786 = vmatpush1.bf16.msra.mxu0 %v1354_v61 }
  0x96   :  { %1028 = vmatpush1.bf16.msra.mxu1 %v1357_v62  ;;  %787 = vmatprep.subr.bf16.mxu0 %v1362_v0 }
  0x97   :  { %1029 = vmatprep.subr.bf16.mxu1 %v1365_v1 }
  0x99   :  { %788 = vmatpush1.bf16.msra.mxu0 %v1360_v2 }
  0x9a   :  { %1030 = vmatpush1.bf16.msra.mxu1 %v1363_v3  ;;  %789 = vmatprep.subr.bf16.mxu0 %v1368_v4 }
  0x9b   :  { %1031 = vmatprep.subr.bf16.mxu1 %v1371_v5 }
  0x9d   :  { %790 = vmatpush1.bf16.msra.mxu0 %v1366_v6 }
  0x9e   :  { %1032 = vmatpush1.bf16.msra.mxu1 %v1369_v7  ;;  %791 = vmatprep.subr.bf16.mxu0 %v1374_v8 }
  0x9f   :  { %1033 = vmatprep.subr.bf16.mxu1 %v1377_v9 }
  0xa1   :  { %792 = vmatpush1.bf16.msra.mxu0 %v1372_v10 }
  0xa2   :  { %1034 = vmatpush1.bf16.msra.mxu1 %v1375_v11  ;;  %793 = vmatprep.subr.bf16.mxu0 %v1380_v13 }
  0xa3   :  { %1035 = vmatprep.subr.bf16.mxu1 %v1383_v14 }
  0xa5   :  { %794 = vmatpush1.bf16.msra.mxu0 %v1378_v16 }
  0xa6   :  { %1036 = vmatpush1.bf16.msra.mxu1 %v1381_v17  ;;  %795 = vmatprep.subr.bf16.mxu0 %v1386_v18 }
  0xa7   :  { %1037 = vmatprep.subr.bf16.mxu1 %v1389_v19 }
  0xa9   :  { %796 = vmatpush1.bf16.msra.mxu0 %v1384_v21 }
  0xaa   :  { %1038 = vmatpush1.bf16.msra.mxu1 %v1387_v22  ;;  %797 = vmatprep.subr.bf16.mxu0 %v1392_v23 }
  0xab   :  { %1039 = vmatprep.subr.bf16.mxu1 %v1395_v24 }
  0xad   :  { %798 = vmatpush1.bf16.msra.mxu0 %v1390_v26 }
  0xae   :  { %1040 = vmatpush1.bf16.msra.mxu1 %v1393_v27  ;;  %799 = vmatprep.subr.bf16.mxu0 %v1398_v28 }
  0xaf   :  { %1041 = vmatprep.subr.bf16.mxu1 %v1401_v29 }
  0xb1   :  { %800 = vmatpush1.bf16.msra.mxu0 %v1396_v31 }
  0xb2   :  { %1042 = vmatpush1.bf16.msra.mxu1 %v1399_v32 }
  0xb4   :  { %802 = vmatmul.mubr.bf16.vlgmr.msra.gmra.mrb[4].mxu0 %v574_v34 }
  0xb5   :  { %1044 = vmatmul.mubr.bf16.vlgmr.msra.gmra.mrb[4].mxu1 %v816_v35 }
 0x147   :  { %v308_v36 = vpop.f32.mrb[0].mxu0 }
 0x148   :  { %v547_v37 = vpop.f32.mrb[0].mxu1  ;;  %315 = vst [vmem:[%s1600_s5] sm:$0x3f] %v308_v36  ;;  %v310_v38 = vpop.f32.mrb[1].mxu0 }
 0x149   :  { %554 = vst [vmem:[%s1601_s6] sm:$0x3f] %v547_v37  ;;  %v549_v39 = vpop.f32.mrb[1].mxu1  ;;  %316 = vst [vmem:[%s1600_s5 + $0x8] sm:$0x3f] %v310_v38  ;;  %v312_v40 = vpop.f32.mrb[2].mxu0 }
 0x14a   :  { %555 = vst [vmem:[%s1601_s6 + $0x8] sm:$0x3f] %v549_v39  ;;  %v551_v41 = vpop.f32.mrb[2].mxu1  ;;  %v313_v42 = vpop.f32.mrb[3].mxu0 }
 0x14b   :  { %v552_v43 = vpop.f32.mrb[3].mxu1 }
 0x187   :  { %v803_v44 = vpop.f32.mrb[4].mxu0 }
 0x188   :  { %v1045_v45 = vpop.f32.mrb[4].mxu1  ;;  %1167 = vst [vmem:[%s1600_s5 + $0x10] sm:$0x3f] %v803_v44  ;;  %v805_v46 = vpop.f32.mrb[5].mxu0 }
 0x189   :  { %1203 = vst [vmem:[%s1601_s6 + $0x10] sm:$0x3f] %v1045_v45  ;;  %v1047_v47 = vpop.f32.mrb[5].mxu1  ;;  %1168 = vst [vmem:[%s1600_s5 + $0x18] sm:$0x3f] %v805_v46  ;;  %v807_v48 = vpop.f32.mrb[6].mxu0 }
 0x18a   :  { %1204 = vst [vmem:[%s1601_s6 + $0x18] sm:$0x3f] %v1047_v47  ;;  %v1049_v49 = vpop.f32.mrb[6].mxu1  ;;  %v808_v50 = vpop.f32.mrb[7].mxu0 }
 0x18b   :  { %v1050_v51 = vpop.f32.mrb[7].mxu1 }
 0x18c   :  { %1063 = vsyncpa [#allocation3], 1 }
 0x18d   :  { %1064 = vsyncpa [#allocation7], 1 }
 0x18e   :  { %1065 = vsyncpa [#allocation4], 1 }

</bundles_post_ra>
